<compile_context>
chip_gen: v6e
topology: v6e:2x2x1
jax: 0.10.0
libtpu: 0.0.40
codegen_flags: <defaults>
</compile_context>

<pallas_src>
import functools

import jax
import jax.numpy as jnp
from jax.experimental import pallas as pl
from jax.experimental.pallas import tpu as pltpu


def _cnn_kernel(x_ref, wc_ref, wl_ref, bl_ref, o_ref, *, cout, k_size, l_pool):
    """One batch tile: conv(+pad) -> dropout(eval) -> maxpool(stride=1) -> linear."""
    # In-kernel cast of the f32 activation block (no-op when compute dtype is f32);
    # keeps the wrapper free of any materialized astype HBM round trip.
    x = x_ref[...].astype(wc_ref.dtype)

    # ---- Conv1d: single MXU matmul against the Toeplitz-expanded weight ----
    acc = jnp.dot(x, wc_ref[...], preferred_element_type=jnp.float32)   # (bt, L_conv*Cout) f32
    # (conv bias is folded into the linear bias at prep time)

    # ---- Dropout: identity in eval/inference mode ----
    # TODO(synk): training-mode dropout (pltpu.prng_* mask + 1/(1-p) scaling) not implemented.

    # ---- MaxPool1d(kernel_size=K, stride=1): max over lane-shifted windows ----
    width = l_pool * cout
    pooled = acc[:, 0:width]
    for k in range(1, k_size):                      # K is small & static
        pooled = jnp.maximum(pooled, acc[:, k * cout:k * cout + width])

    # ---- Linear over flattened pooled features: single MXU matmul ----
    out = jnp.dot(pooled.astype(wl_ref.dtype), wl_ref[...],
                  preferred_element_type=jnp.float32)
    o_ref[...] = (out + bl_ref[...]).astype(o_ref.dtype)


def prepare_params(w_conv, b_conv, w_lin, b_lin, *, seq_len, padding,
                   compute_dtype=jnp.float32, linear_dtype=None):
    """One-time weight re-layout (hoisted out of the per-call hot path).

    w_conv: (Cout, Cin, K)  b_conv: (Cout,)   [PyTorch Conv1d layout]
    w_lin : (out_dim, L_pool*Cout)  b_lin: (out_dim,)  [PyTorch Linear layout]
    linear_dtype: dtype of the Linear weight (default = compute_dtype); keep f32 on v5e.
    """
    cout, cin, k_size = w_conv.shape
    l_conv = seq_len + 2 * padding - k_size + 1
    l_pool = l_conv - k_size + 1
    out_dim = w_lin.shape[0]
    if linear_dtype is None:
        linear_dtype = compute_dtype

    # Toeplitz ("im2col in the weight") conv matrix, zero padding folded in.
    wt = jnp.transpose(w_conv, (2, 1, 0)).astype(jnp.float32)               # (K, Cin, Cout)
    wfull = jnp.zeros((seq_len + 2 * padding, cin, l_conv, cout), jnp.float32)
    for m in range(l_conv):                                                 # tiny static prep loop
        wfull = wfull.at[m:m + k_size, :, m, :].set(wt)
    wc = wfull[padding:padding + seq_len].reshape(seq_len * cin, l_conv * cout)

    # Linear weight re-laid-out so lane order (l*Cout + c) matches PyTorch's
    # channel-major (Cout, L_pool).view flatten order (c*L_pool + l).
    wl = jnp.transpose(w_lin.astype(jnp.float32).reshape(out_dim, cout, l_pool),
                       (2, 1, 0)).reshape(l_pool * cout, out_dim)           # (L_pool*Cout, out)

    # Fold the conv bias into the linear bias: MaxPool commutes with a per-channel
    # constant, and Linear is affine ->  bl' = bl + tile(b_conv, L_pool) @ wl.
    bc_flat = jnp.tile(b_conv.astype(jnp.float32), (l_pool,))               # order (l*Cout + c)
    bl_folded = (b_lin.astype(jnp.float32) + bc_flat @ wl).reshape(1, out_dim)

    params = (wc.astype(compute_dtype), wl.astype(linear_dtype), bl_folded)
    meta = dict(cout=cout, cin=cin, k_size=k_size, seq_len=seq_len,
                l_conv=l_conv, l_pool=l_pool, out_dim=out_dim)
    return params, meta


def _round_up(v, m):
    return -(-v // m) * m


def _num_tensorcores():
    """2 on dual-TC / megacore parts (v7x, v4, v5p), else 1 (v5e, v6e)."""
    try:
        kind = jax.devices()[0].device_kind.lower()
    except Exception:
        return 1
    if any(tag in kind for tag in ("v7", "7x", "v4", "v5p")):
        return 2
    return 1


def _pick_b_tile(B, b_tile, max_tile=1024):
    """Batch-tile rows per grid step."""
    if b_tile is not None:
        bt = min(int(b_tile), B)
        if bt < B and bt % 8:
            bt = _round_up(bt, 8)          # 8-aligned so a ragged last block is legal
        return B if bt >= B else bt
    num_tc = _num_tensorcores()
    if num_tc <= 1:
        # Single TC (v5e/v6e): one big step amortizes the ~0.35 us/step grid overhead.
        return B if B <= max_tile else max_tile
    # Dual TC (v7x / megacore): >= num_tc grid steps so "parallel" feeds both cores,
    # keeping the step count a multiple of num_tc (even split).
    steps = num_tc
    bt = _round_up(pl.cdiv(B, steps), 8)
    while bt > max_tile:
        steps += num_tc
        bt = _round_up(pl.cdiv(B, steps), 8)
    return B if bt >= B else bt


def cnnmodule1_forward(x, params, meta, *, b_tile=None):
    """x: (B, S, Cin) float32, channels-last (the PyTorch forward transposes to NCL itself)."""
    wc, wl, bl = params
    B, S, Cin = x.shape
    assert S == meta["seq_len"] and Cin == meta["cin"]
    l_conv, l_pool = meta["l_conv"], meta["l_pool"]
    cout, out_dim, k_size = meta["cout"], meta["out_dim"], meta["k_size"]

    # f32 re-layout only — no wrapper-side astype, no jnp.pad: the ragged last block
    # (when B % bt != 0) is handled by Pallas (padded reads, masked writes).
    x2 = x.reshape(B, S * Cin)
    bt = _pick_b_tile(B, b_tile)

    kernel = functools.partial(_cnn_kernel, cout=cout, k_size=k_size, l_pool=l_pool)
    return pl.pallas_call(
        kernel,
        out_shape=jax.ShapeDtypeStruct((B, out_dim), jnp.float32),
        grid=(pl.cdiv(B, bt),),
        in_specs=[
            pl.BlockSpec((bt, S * Cin), lambda i: (i, 0)),
            pl.BlockSpec((S * Cin, l_conv * cout), lambda i: (0, 0)),
            pl.BlockSpec((l_pool * cout, out_dim), lambda i: (0, 0)),
            pl.BlockSpec((1, out_dim), lambda i: (0, 0)),
        ],
        out_specs=pl.BlockSpec((bt, out_dim), lambda i: (i, 0)),
        compiler_params=pltpu.CompilerParams(
            dimension_semantics=("parallel",)),       # batch grid shards across v7x's 2 TCs
    )(x2, wc, wl, bl)


def _torch_reference(x, w_conv, b_conv, w_lin, b_lin, *, padding, k_size):
    """Pure-JAX replica of the PyTorch forward (eval mode)."""
    xt = jnp.transpose(x, (0, 2, 1))                                    # (B, Cin, S)
    y = jax.lax.conv_general_dilated(xt, w_conv, (1,), [(padding, padding)],
                                     dimension_numbers=("NCH", "OIH", "NCH"))
    y = y + b_conv[None, :, None]
    pooled = jax.lax.reduce_window(y, -jnp.inf, jax.lax.max,
                                   (1, 1, k_size), (1, 1, 1), "VALID")
    return pooled.reshape(x.shape[0], -1) @ w_lin.T + b_lin


if __name__ == "__main__":
    key = jax.random.PRNGKey(0)
    B, S, Cin, Cout, K, pad, out_dim = 2, 16, 4, 8, 3, 1, 32
    L_conv = S + 2 * pad - K + 1          # 16
    length = L_conv - K + 1               # 14 (== `length` ctor arg; length*out_channel = 112)

    k1, k2, k3, k4, k5, k6 = jax.random.split(key, 6)
    x = jax.random.normal(k1, (B, S, Cin), jnp.float32)
    w_conv = jax.random.normal(k2, (Cout, Cin, K), jnp.float32) * 0.1
    b_conv = jax.random.normal(k3, (Cout,), jnp.float32) * 0.1
    w_lin = jax.random.normal(k4, (out_dim, length * Cout), jnp.float32) * 0.1
    b_lin = jax.random.normal(k5, (out_dim,), jnp.float32) * 0.1

    ref = _torch_reference(x, w_conv, b_conv, w_lin, b_lin, padding=pad, k_size=K)

    # 1) f32 operands — strict numerical check (single exact-size grid step).
    params32, meta = prepare_params(w_conv, b_conv, w_lin, b_lin,
                                    seq_len=S, padding=pad, compute_dtype=jnp.float32)
    out32 = jax.block_until_ready(cnnmodule1_forward(x, params32, meta))
    assert jnp.allclose(out32, ref, atol=1e-4, rtol=1e-4)

    # 2) bf16 matmul operands (cast in-kernel), f32 accumulation — v6e/v7x MXU path.
    params16, _ = prepare_params(w_conv, b_conv, w_lin, b_lin,
                                 seq_len=S, padding=pad, compute_dtype=jnp.bfloat16)
    out16 = jax.block_until_ready(cnnmodule1_forward(x, params16, meta))
    assert jnp.allclose(out16, ref, atol=5e-2, rtol=5e-2)

    # 2b) bf16 conv matmul, f32 linear matmul (the v5e-friendly mixed path).
    params_mix, _ = prepare_params(w_conv, b_conv, w_lin, b_lin,
                                   seq_len=S, padding=pad,
                                   compute_dtype=jnp.bfloat16, linear_dtype=jnp.float32)
    out_mix = jax.block_until_ready(cnnmodule1_forward(x, params_mix, meta))
    assert jnp.allclose(out_mix, ref, atol=5e-2, rtol=5e-2)

    # 3) Gridded batch path with a ragged last block (B % bt != 0): exercises the
    #    no-pad masked path and the "parallel" batch grid.
    xb = jax.random.normal(k6, (250, S, Cin), jnp.float32)
    refb = _torch_reference(xb, w_conv, b_conv, w_lin, b_lin, padding=pad, k_size=K)
    outb = jax.block_until_ready(cnnmodule1_forward(xb, params32, meta, b_tile=96))
    assert jnp.allclose(outb, refb, atol=1e-4, rtol=1e-4)

    # 4) Auto tile selection (single huge tile on v5e/v6e, even >=2-step grid on v7x).
    xc = xb[:248]
    refc = refb[:248]
    outc = jax.block_until_ready(cnnmodule1_forward(xc, params32, meta, b_tile=None))
    assert jnp.allclose(outc, refc, atol=1e-4, rtol=1e-4)

    print("KERNEL_OK")
</pallas_src>

<mosaic_0001>
module attributes {stable_mosaic.version = 11 : i64} {
  func.func @_cnn_kernel(%arg0: i32, %arg1: memref<2x64xf32, #tpu.memory_space<vmem>>, %arg2: memref<64x128xf32, #tpu.memory_space<vmem>>, %arg3: memref<112x32xf32, #tpu.memory_space<vmem>>, %arg4: memref<1x32xf32, #tpu.memory_space<vmem>>, %arg5: memref<2x32xf32, #tpu.memory_space<vmem>>) attributes {dimension_semantics = [#tpu.dimension_semantics<parallel>], iteration_bounds = array<i64: 1>, scalar_prefetch = 0 : i64, scratch_operands = 0 : i64, tpu.core_type = #tpu.core_type<tc>, window_params = [{transform_indices = @transform_0, window_bounds = array<i64: 2, 64>}, {pipeline_mode = #tpu.pipeline_mode<synchronous>, transform_indices = @transform_1, window_bounds = array<i64: 64, 128>}, {pipeline_mode = #tpu.pipeline_mode<synchronous>, transform_indices = @transform_2, window_bounds = array<i64: 112, 32>}, {pipeline_mode = #tpu.pipeline_mode<synchronous>, transform_indices = @transform_3, window_bounds = array<i64: 1, 32>}, {transform_indices = @transform_4, window_bounds = array<i64: 2, 32>}]} {
    %c0 = arith.constant 0 : index
    %c0_0 = arith.constant 0 : index
    %0 = vector.load %arg1[%c0, %c0_0] : memref<2x64xf32, #tpu.memory_space<vmem>>, vector<2x64xf32>
    %c0_1 = arith.constant 0 : index
    %c0_2 = arith.constant 0 : index
    %1 = vector.load %arg2[%c0_1, %c0_2] : memref<64x128xf32, #tpu.memory_space<vmem>>, vector<64x128xf32>
    %cst = arith.constant dense<0.000000e+00> : vector<2x128xf32>
    %2 = tpu.matmul %0, %1, %cst {dimension_numbers = #tpu.dot_dimension_numbers<[1], [0], [0], [1], [0, 0, 1, 1], [], []>} : vector<2x64xf32>, vector<64x128xf32>, vector<2x128xf32> -> vector<2x128xf32>
    %3 = vector.extract_strided_slice %2 {offsets = [0, 0], sizes = [2, 112], strides = [1, 1]} : vector<2x128xf32> to vector<2x112xf32>
    %4 = vector.extract_strided_slice %2 {offsets = [0, 8], sizes = [2, 112], strides = [1, 1]} : vector<2x128xf32> to vector<2x112xf32>
    %5 = arith.maximumf %3, %4 : vector<2x112xf32>
    %6 = vector.extract_strided_slice %2 {offsets = [0, 16], sizes = [2, 112], strides = [1, 1]} : vector<2x128xf32> to vector<2x112xf32>
    %7 = arith.maximumf %5, %6 : vector<2x112xf32>
    %c0_3 = arith.constant 0 : index
    %c0_4 = arith.constant 0 : index
    %8 = vector.load %arg3[%c0_3, %c0_4] : memref<112x32xf32, #tpu.memory_space<vmem>>, vector<112x32xf32>
    %cst_5 = arith.constant dense<0.000000e+00> : vector<2x32xf32>
    %9 = tpu.matmul %7, %8, %cst_5 {dimension_numbers = #tpu.dot_dimension_numbers<[1], [0], [0], [1], [0, 0, 1, 1], [], []>} : vector<2x112xf32>, vector<112x32xf32>, vector<2x32xf32> -> vector<2x32xf32>
    %c0_6 = arith.constant 0 : index
    %c0_7 = arith.constant 0 : index
    %10 = vector.load %arg4[%c0_6, %c0_7] : memref<1x32xf32, #tpu.memory_space<vmem>>, vector<1x32xf32>
    %11 = vector.broadcast %10 : vector<1x32xf32> to vector<2x32xf32>
    %12 = arith.addf %9, %11 : vector<2x32xf32>
    %c0_8 = arith.constant 0 : index
    %c0_9 = arith.constant 0 : index
    %13 = vector.load %arg5[%c0_8, %c0_9] : memref<2x32xf32, #tpu.memory_space<vmem>>, vector<2x32xf32>
    tpu.vector_store %arg5[%c0_8, %c0_9], %12 {strides = array<i32>} : memref<2x32xf32, #tpu.memory_space<vmem>>, vector<2x32xf32>,
    return
  }
  func.func @transform_0(%arg0: i32) -> (i32, i32) {
    %c0_i32 = arith.constant 0 : i32
    %c0_i32_0 = arith.constant 0 : i32
    return %arg0, %c0_i32 : i32, i32
  }
  func.func @transform_1(%arg0: i32) -> (i32, i32) {
    %c0_i32 = arith.constant 0 : i32
    %c0_i32_0 = arith.constant 0 : i32
    %c0_i32_1 = arith.constant 0 : i32
    return %c0_i32, %c0_i32_0 : i32, i32
  }
  func.func @transform_2(%arg0: i32) -> (i32, i32) {
    %c0_i32 = arith.constant 0 : i32
    %c0_i32_0 = arith.constant 0 : i32
    %c0_i32_1 = arith.constant 0 : i32
    return %c0_i32, %c0_i32_0 : i32, i32
  }
  func.func @transform_3(%arg0: i32) -> (i32, i32) {
    %c0_i32 = arith.constant 0 : i32
    %c0_i32_0 = arith.constant 0 : i32
    %c0_i32_1 = arith.constant 0 : i32
    return %c0_i32, %c0_i32_0 : i32, i32
  }
  func.func @transform_4(%arg0: i32) -> (i32, i32) {
    %c0_i32 = arith.constant 0 : i32
    %c0_i32_0 = arith.constant 0 : i32
    return %arg0, %c0_i32 : i32, i32
  }
}

</mosaic_0001>

<bundles_post_ra>
// kernel: tpu_custom_call.1
= control target key start
LH: loop header
LB: loop body
LE: loop exit
PB: predicated region body
PF: predicated region fallthrough
CT: control target
= control target key end

     0   :  { %v325_v1 = vmov 0.0   ;;  %vm326_vm0 = vmmov 0   ;;  %s454_s0 = inlined_call_operand.vmem [shape: f32[2,64], index: 0, kind: input, shape index: {}]   ;;  %s455_s1 = inlined_call_operand.vmem [shape: f32[64,128], index: 1, kind: input, shape index: {}]   ;;  %s456_s2 = inlined_call_operand.vmem [shape: f32[112,32], index: 2, kind: input, shape index: {}]   ;;  %s457_s3 = inlined_call_operand.vmem [shape: f32[1,32], index: 3, kind: input, shape index: {}]   ;;  %s458_s4 = inlined_call_operand.hbm [shape: f32[2,32], index: 4, kind: output, shape index: {}]  }
   0x1   :  { %v26_v0 = vld [vmem:[%s455_s1 + $0x38] sm:$0xff]  ;;  %248 = vmatprep.subr.mxu0 %v325_v1  ;;  %v25_v2 = vld [vmem:[%s455_s1 + $0x30] sm:$0xff]  ;;  %264 = vmatprep.mubr.msk.f32.mxu0 %vm326_vm0, %v325_v1  ;;  %v24_v3 = vld [vmem:[%s455_s1 + $0x28] sm:$0xff] }
   0x2   :  { %249 = vmatpush3.msra.mxu0 %v26_v0  ;;  %267 = vmatprep.subr.mxu1 %v325_v1 }
   0x3   :  { %250 = vmatprep.subr.mxu0 %v325_v1  ;;  %295 = vmatprep.mubr.msk.f32.mxu1 %vm326_vm0, %v325_v1 }
   0x4   :  { %9 = vsyncpa [#allocation3], 0  ;;  %251 = vmatpush3.msra.mxu0 %v25_v2  ;;  %v23_v4 = vld [vmem:[%s455_s1 + $0x20] sm:$0xff]  ;;  %v22_v5 = vld [vmem:[%s455_s1 + $0x18] sm:$0xff]  ;;  %vm27_vm1 = vcmask 523264   ;;  %s327_s7 = smov 120  }
   0x5   :  { %252 = vmatprep.subr.mxu0 %v325_v1  ;;  %v21_v6 = vld [vmem:[%s455_s1 + $0x10] sm:$0xff]  ;;  %v20_v7 = vld [vmem:[%s455_s1 + $0x8] sm:$0xff]  ;;  %v19_v8 = vld [vmem:[%s455_s1] sm:$0xff]  ;;  %s328_s8 = smov 112   ;;  %vm131_vm2 = vcmask 916480   ;;  %s329_s1 = smov [#allocation2]  }
   0x6   :  { %253 = vmatpush3.msra.mxu0 %v24_v3  ;;  %v18_v9 = vld [vmem:[%s454_s0] sm:$0x3]  ;;  %v123_v10 = vld [vmem:[%s456_s2 + $0x68] sm:$0xff]  ;;  %v121_v12 = vld [vmem:[%s456_s2 + $0x58] sm:$0xff]  ;;  %s213_s11 = sshll.u32 %s329_s1, 4  ;;  %vm205_vm3 = vcmask 254976   ;;  %s214_s11 = int_to_ptr.vmem [resolvable:$true] %s213_s11 }
   0x7   :  { %254 = vmatprep.subr.mxu0 %v325_v1  ;;  %v122_v11 = vld [vmem:[%s456_s2 + $0x60] sm:$0xff]  ;;  %268 = vmatpush3.msra.mxu1 %v123_v10  ;;  %v120_v13 = vld [vmem:[%s456_s2 + $0x50] sm:$0xff]  ;;  %v119_v14 = vld [vmem:[%s456_s2 + $0x48] sm:$0xff]  ;;  %p308_p1 = scmp.lt.s32.totalorder %s214_s11, %s214_s11 }
   0x8   :  { %255 = vmatpush3.msra.mxu0 %v23_v4  ;;  %269 = vmatprep.subr.mxu1 %v325_v1  ;;  %v118_v15 = vld [vmem:[%s456_s2 + $0x40] sm:$0xff]  ;;  %v117_v16 = vld [vmem:[%s456_s2 + $0x38] sm:$0xff]  ;;  %v116_v17 = vld [vmem:[%s456_s2 + $0x30] sm:$0xff] }
   0x9   :  { %256 = vmatprep.subr.mxu0 %v325_v1  ;;  %270 = vmatpush3.msra.mxu1 %v122_v11  ;;  %v115_v18 = vld [vmem:[%s456_s2 + $0x28] sm:$0xff]  ;;  %v114_v19 = vld [vmem:[%s456_s2 + $0x20] sm:$0xff]  ;;  %v113_v20 = vld [vmem:[%s456_s2 + $0x18] sm:$0xff] }
   0xa   :  { %257 = vmatpush3.msra.mxu0 %v22_v5  ;;  %271 = vmatprep.subr.mxu1 %v325_v1  ;;  %v112_v21 = vld [vmem:[%s456_s2 + $0x10] sm:$0xff]  ;;  %v111_v22 = vld [vmem:[%s456_s2 + $0x8] sm:$0xff]  ;;  %v110_v23 = vld [vmem:[%s456_s2] sm:$0xff]  ;;  %s303_s2 = scalar_lea.vmem %s214_s11, 32 }
   0xb   :  { %258 = vmatprep.subr.mxu0 %v325_v1  ;;  %272 = vmatpush3.msra.mxu1 %v121_v12  ;;  %v222_v30 = vld [vmem:[%s457_s3] ss:$0 sm:$0xff]  ;;  %p304_p0 = scmp.ne.s32.totalorder %s214_s11, %s303_s2  ;;  %p309_p2 = scmp.lt.s32.totalorder %s303_s2, %s303_s2 }
   0xc   :  { %259 = vmatpush3.msra.mxu0 %v21_v6  ;;  %273 = vmatprep.subr.mxu1 %v325_v1 }
   0xd   :  { %260 = vmatprep.subr.mxu0 %v325_v1  ;;  %274 = vmatpush3.msra.mxu1 %v120_v13  ;;  %p310_p3 = por %p309_p2, %p308_p1 }
   0xe   :  { %261 = vmatpush3.msra.mxu0 %v20_v7  ;;  %275 = vmatprep.subr.mxu1 %v325_v1 }
   0xf   :  { %262 = vmatprep.subr.mxu0 %v325_v1  ;;  %276 = vmatpush3.msra.mxu1 %v119_v14  ;;  %p311_p4 = pnand %p310_p3, %p304_p0 }
  0x10   :  { %263 = vmatpush3.msra.mxu0 %v19_v8  ;;  %277 = vmatprep.subr.mxu1 %v325_v1 }
  0x11   :  { %265 = vmatmul.mubr.msk.f32.vlgmr.msra.gmra.mxu0 %vm27_vm1, %v18_v9  ;;  %278 = vmatpush3.msra.mxu1 %v118_v15 }
  0x12   :  { %279 = vmatprep.subr.mxu1 %v325_v1 }
  0x13   :  { %280 = vmatpush3.msra.mxu1 %v117_v16 }
  0x14   :  { %281 = vmatprep.subr.mxu1 %v325_v1 }
  0x15   :  { %282 = vmatpush3.msra.mxu1 %v116_v17 }
  0x16   :  { %283 = vmatprep.subr.mxu1 %v325_v1 }
  0x17   :  { %284 = vmatpush3.msra.mxu1 %v115_v18 }
  0x18   :  { %285 = vmatprep.subr.mxu1 %v325_v1 }
  0x19   :  { %286 = vmatpush3.msra.mxu1 %v114_v19 }
  0x1a   :  { %287 = vmatprep.subr.mxu1 %v325_v1 }
  0x1b   :  { %288 = vmatpush3.msra.mxu1 %v113_v20 }
  0x1c   :  { %289 = vmatprep.subr.mxu1 %v325_v1 }
  0x1d   :  { %290 = vmatpush3.msra.mxu1 %v112_v21 }
  0x1e   :  { %291 = vmatprep.subr.mxu1 %v325_v1 }
  0x1f   :  { %292 = vmatpush3.msra.mxu1 %v111_v22 }
  0x20   :  { %293 = vmatprep.subr.mxu1 %v325_v1 }
  0x21   :  { %294 = vmatpush3.msra.mxu1 %v110_v23 }
  0xd1   :  { %v97_v24 = vpop.f32.mrf.mxu0 }
  0xd2   :  { %102 = vrot.lane.b32.xlu0 %v97_v24, %s327_s7 }
  0xd3   :  { %v266_v25 = vpop.f32.mrf.mxu0 }
  0xd6   :  { %106 = vrot.lane.b32.xlu0 %v97_v24, %s328_s8 }
 0x144   :  { %v103_v26 = vpop.permute.xlu0 %102 }
 0x145   :  { %v105_v27 = vmax.f32 %v97_v24, %v103_v26 }
 0x148   :  { %v107_v28 = vpop.permute.xlu0 %106 }
 0x149   :  { %v109_v29 = vmax.f32 %v105_v27, %v107_v28 }
 0x14b   :  { %296 = vmatmul.mubr.msk.f32.vlgmr.msra.gmra.mxu1 %vm131_vm2, %v109_v29 }
 0x20b   :  { %v201_v31 = vpop.f32.mrf.mxu1 }
 0x20c   :  { %v202_v32 = vadd.f32 %v222_v30, %v201_v31 }
 0x20d   :  { %v297_v33 = vpop.f32.mrf.mxu1 }
 0x20e   :  { %206 = vst.msk [vmem:[#allocation2] sm:$0x3] %vm205_vm3, %v202_v32 }
 0x20f   :  { %314 = shalt.err (!%p311_p4)
}
 0x210   :  { %216 = dma.vmem_to_hbm [thread:$0]  %s214_s11, 32, %s458_s4, [#allocation3]  }
 0x211   :  { %323 = dma.done.wait [#allocation3], 32  }
 0x212   :  { %324 = vsyncadd [#allocation3], 4294967264 }
 0x213   :  { %220 = vsyncpa [#allocation3], 1 }

</bundles_post_ra>
